<compile_context>
chip_gen: v6e
topology: v6e:2x2x1
jax: 0.10.0
libtpu: 0.0.40
codegen_flags: <defaults>
</compile_context>

<pallas_src>
import jax
import jax.numpy as jnp
from jax.experimental import pallas as pl
from jax.experimental.pallas import tpu as pltpu


def _round_up(x, m):
    return ((x + m - 1) // m) * m


def _shrink_div(t, total, step):
    """Next smaller multiple of `step` below `t` that divides `total`."""
    for d in range(t - step, step - 1, -step):
        if total % d == 0:
            return d
    return step


# ----------------------------------------------------------------------------
# Kernels
# ----------------------------------------------------------------------------

def _sigmoid_f32(z):
    # sigmoid(z) = 0.5 * tanh(z/2) + 0.5 : one EUP op, saturates cleanly at the
    # tails (no exp overflow, no reciprocal of inf), and the EUP slot is
    # otherwise idle so it overlaps the next tile's MXU feed.
    return 0.5 * jnp.tanh(0.5 * z) + 0.5


def _fullk_kernel(x_ref, wt_ref, b_ref, o_ref):
    """Weight-resident path: whole K and whole OUT in one block.
    No accumulator scratch, no K phases: dot + bias + sigmoid -> o_ref."""
    z = jnp.dot(x_ref[...], wt_ref[...], preferred_element_type=jnp.float32)
    o_ref[...] = _sigmoid_f32(z + b_ref[...]).astype(o_ref.dtype)


def _tiled_kernel(x_ref, wt_ref, b_ref, o_ref, acc_ref):
    """General tiled path: f32 VMEM accumulator over the innermost K grid axis,
    epilogue fused on the last K step."""
    k = pl.program_id(2)

    @pl.when(k == 0)
    def _():
        acc_ref[...] = jnp.zeros_like(acc_ref)

    acc_ref[...] += jnp.dot(x_ref[...], wt_ref[...],
                            preferred_element_type=jnp.float32)

    @pl.when(k == pl.num_programs(2) - 1)
    def _():
        o_ref[...] = _sigmoid_f32(acc_ref[...] + b_ref[...]).astype(o_ref.dtype)


# ----------------------------------------------------------------------------
# Wrapper
# ----------------------------------------------------------------------------

def perceptron(x, weight, bias, *,
               compute_dtype=jnp.bfloat16,
               tb_cap=1024, tn_cap=512, tk_cap=2048,
               vmem_budget_bytes=28 * 1024 * 1024,
               vmem_limit_bytes=48 * 1024 * 1024,
               force_tiled=False):
    """sigmoid(x @ weight.T + bias).

    x:      [B, IN]
    weight: [OUT, IN]   (PyTorch nn.Linear layout)
    bias:   [OUT]
    returns [B, OUT] in x.dtype (f32 accumulate / f32 epilogue regardless of
    compute_dtype).
    """
    B, IN = x.shape
    OUT, IN_w = weight.shape
    assert IN == IN_w and bias.shape == (OUT,)
    out_dtype = x.dtype

    if compute_dtype is not None:
        x = x.astype(compute_dtype)
        weight = weight.astype(compute_dtype)

    # One-time transpose (fuses with the cast above); gives the canonical
    # (K, N) RHS so the in-kernel dot never needs an XLU transpose.
    wt = weight.T                                   # [IN, OUT]
    b2 = bias.reshape(1, OUT).astype(jnp.float32)

    es_in = jnp.dtype(x.dtype).itemsize
    es_out = jnp.dtype(out_dtype).itemsize

    def footprint(TB, TN, TK, k_blocks):
        w = 2 * TK * TN * es_in                     # (double-buffered) weight tile
        xb = 2 * TB * TK * es_in
        ob = 2 * TB * TN * es_out
        bb = 2 * TN * 4
        acc = TB * TN * 4 if k_blocks > 1 else 0
        return w + xb + ob + bb + acc

    Bp8 = _round_up(B, 8)
    Np = _round_up(OUT, 128)                        # lane-aligned (only pads if needed)
    Kp = _round_up(IN, 128)

    use_fullk = (not force_tiled) and footprint(8, Np, Kp, 1) <= vmem_budget_bytes

    if use_fullk:
        # ---------------- weight-resident, full-K path ----------------------
        tb_lim = max(8, (min(tb_cap, Bp8) // 8) * 8)
        while tb_lim > 8 and footprint(tb_lim, Np, Kp, 1) > vmem_budget_bytes:
            tb_lim = max(8, _round_up(tb_lim // 2, 8))

        # Prefer a TB that divides the (8-aligned) batch -> no batch padding,
        # unless that would force tiny tiles (too many ~0.35us grid steps).
        divs = [d for d in range(8, tb_lim + 1, 8) if Bp8 % d == 0]
        TB = divs[-1] if divs and divs[-1] >= max(8, tb_lim // 4) else tb_lim

        if TB == Bp8 and Bp8 >= 16 and Bp8 % 16 == 0:
            TB = Bp8 // 2                           # >=2 blocks for v7x's 2 TensorCores

        Bp = _round_up(B, TB)

        if (Bp, Kp) != (B, IN):
            x = jnp.pad(x, ((0, Bp - B), (0, Kp - IN)))
        if (Kp, Np) != (IN, OUT):
            wt = jnp.pad(wt, ((0, Kp - IN), (0, Np - OUT)))
        if Np != OUT:
            b2 = jnp.pad(b2, ((0, 0), (0, Np - OUT)))

        grid = (Bp // TB,)
        out = pl.pallas_call(
            _fullk_kernel,
            out_shape=jax.ShapeDtypeStruct((Bp, Np), out_dtype),
            grid_spec=pltpu.PrefetchScalarGridSpec(
                num_scalar_prefetch=0,
                grid=grid,
                in_specs=[
                    pl.BlockSpec((TB, Kp), lambda i: (i, 0)),   # x batch tile
                    pl.BlockSpec((Kp, Np), lambda i: (0, 0)),   # weight: resident, DMA'd once
                    pl.BlockSpec((1, Np), lambda i: (0, 0)),    # bias: resident
                ],
                out_specs=pl.BlockSpec((TB, Np), lambda i: (i, 0)),
            ),
            compiler_params=pltpu.CompilerParams(
                dimension_semantics=("parallel",),
                vmem_limit_bytes=vmem_limit_bytes,
            ),
        )(x, wt, b2)
        if (Bp, Np) != (B, OUT):
            out = out[:B, :OUT]
        return out

    # -------------------- general tiled path (large weight) -----------------
    TN = min(tn_cap, Np)
    if Np % TN:
        TN = max(d for d in range(128, TN + 1, 128) if Np % d == 0)
    TK = min(tk_cap, Kp)
    if Kp % TK:
        TK = max(d for d in range(128, TK + 1, 128) if Kp % d == 0)
    TB = max(8, (min(tb_cap, Bp8) // 8) * 8)
    if Bp8 % TB:
        TB = max(d for d in range(8, TB + 1, 8) if Bp8 % d == 0)

    while footprint(TB, TN, TK, 2) > vmem_budget_bytes:
        if TK > 128:
            TK = _shrink_div(TK, Kp, 128)
        elif TB > 8:
            TB = _shrink_div(TB, Bp8, 8)
        elif TN > 128:
            TN = _shrink_div(TN, Np, 128)
        else:
            break

    Bp = Bp8
    # Pad only the operands that actually need it.
    if (Bp, Kp) != (B, IN):
        x = jnp.pad(x, ((0, Bp - B), (0, Kp - IN)))
    if (Kp, Np) != (IN, OUT):
        wt = jnp.pad(wt, ((0, Kp - IN), (0, Np - OUT)))
    if Np != OUT:
        b2 = jnp.pad(b2, ((0, 0), (0, Np - OUT)))

    grid = (Bp // TB, Np // TN, Kp // TK)
    out = pl.pallas_call(
        _tiled_kernel,
        out_shape=jax.ShapeDtypeStruct((Bp, Np), out_dtype),
        grid_spec=pltpu.PrefetchScalarGridSpec(
            num_scalar_prefetch=0,
            grid=grid,
            in_specs=[
                pl.BlockSpec((TB, TK), lambda i, j, k: (i, k)),   # x tile
                pl.BlockSpec((TK, TN), lambda i, j, k: (k, j)),   # W^T tile (K, N)
                pl.BlockSpec((1, TN), lambda i, j, k: (0, j)),    # bias tile
            ],
            out_specs=pl.BlockSpec((TB, TN), lambda i, j, k: (i, j)),
            scratch_shapes=[pltpu.VMEM((TB, TN), jnp.float32)],
        ),
        compiler_params=pltpu.CompilerParams(
            dimension_semantics=("parallel", "parallel", "arbitrary"),
            vmem_limit_bytes=vmem_limit_bytes,
        ),
    )(x, wt, b2)
    if (Bp, Np) != (B, OUT):
        out = out[:B, :OUT]
    return out


if __name__ == "__main__":
    key = jax.random.PRNGKey(0)
    k_x, k_w, k_b, k_x2, k_w2, k_b2 = jax.random.split(key, 6)

    batch, input_size, output_size = 8, 32, 16

    x = jax.random.normal(k_x, (batch, input_size), dtype=jnp.float32)
    # Deterministic "nn.Linear"-style init (uniform in +-1/sqrt(in)).
    bound = 1.0 / (input_size ** 0.5)
    weight = jax.random.uniform(k_w, (output_size, input_size),
                                minval=-bound, maxval=bound, dtype=jnp.float32)
    bias = jax.random.uniform(k_b, (output_size,),
                              minval=-bound, maxval=bound, dtype=jnp.float32)

    ref = jax.nn.sigmoid(x @ weight.T + bias)

    # 1) f32 compute -- weight-resident full-K kernel, tight tolerance.
    out_f32 = perceptron(x, weight, bias, compute_dtype=jnp.float32)
    jax.block_until_ready(out_f32)
    assert out_f32.shape == (batch, output_size)
    assert jnp.allclose(out_f32, ref, atol=1e-4, rtol=1e-4)

    # 2) default bf16 compute (f32 accumulate) -- same kernel, half HBM bytes.
    out_bf16 = perceptron(x, weight, bias)
    jax.block_until_ready(out_bf16)
    assert out_bf16.shape == (batch, output_size)
    assert jnp.allclose(out_bf16, ref, atol=3e-2, rtol=3e-2)

    # 3) Exercise the tiled K-accumulator kernel (as used when the weight is
    #    too large to keep VMEM-resident) by forcing small tile caps.
    B2, IN2, OUT2 = 32, 256, 384
    x2 = jax.random.normal(k_x2, (B2, IN2), dtype=jnp.float32)
    w2 = jax.random.uniform(k_w2, (OUT2, IN2), minval=-1.0 / 16, maxval=1.0 / 16,
                            dtype=jnp.float32)
    bias2 = jax.random.uniform(k_b2, (OUT2,), minval=-1.0 / 16, maxval=1.0 / 16,
                               dtype=jnp.float32)
    out2 = perceptron(x2, w2, bias2, compute_dtype=jnp.float32,
                      force_tiled=True, tb_cap=16, tn_cap=128, tk_cap=128)
    jax.block_until_ready(out2)
    ref2 = jax.nn.sigmoid(x2 @ w2.T + bias2)
    assert out2.shape == (B2, OUT2)
    assert jnp.allclose(out2, ref2, atol=1e-4, rtol=1e-4)

    print("KERNEL_OK")
</pallas_src>

<mosaic_0001>
module attributes {stable_mosaic.version = 11 : i64} {
  func.func @_fullk_kernel(%arg0: i32, %arg1: memref<8x128xf32, #tpu.memory_space<vmem>>, %arg2: memref<128x128xf32, #tpu.memory_space<vmem>>, %arg3: memref<1x128xf32, #tpu.memory_space<vmem>>, %arg4: memref<8x128xf32, #tpu.memory_space<vmem>>) attributes {dimension_semantics = [#tpu.dimension_semantics<parallel>], iteration_bounds = array<i64: 1>, scalar_prefetch = 0 : i64, scratch_operands = 0 : i64, tpu.core_type = #tpu.core_type<tc>, window_params = [{transform_indices = @transform_0, window_bounds = array<i64: 8, 128>}, {pipeline_mode = #tpu.pipeline_mode<synchronous>, transform_indices = @transform_1, window_bounds = array<i64: 128, 128>}, {pipeline_mode = #tpu.pipeline_mode<synchronous>, transform_indices = @transform_2, window_bounds = array<i64: 1, 128>}, {transform_indices = @transform_3, window_bounds = array<i64: 8, 128>}]} {
    %c0 = arith.constant 0 : index
    %c0_0 = arith.constant 0 : index
    %0 = vector.load %arg1[%c0, %c0_0] : memref<8x128xf32, #tpu.memory_space<vmem>>, vector<8x128xf32>
    %c0_1 = arith.constant 0 : index
    %c0_2 = arith.constant 0 : index
    %1 = vector.load %arg2[%c0_1, %c0_2] : memref<128x128xf32, #tpu.memory_space<vmem>>, vector<128x128xf32>
    %cst = arith.constant dense<0.000000e+00> : vector<8x128xf32>
    %2 = tpu.matmul %0, %1, %cst {dimension_numbers = #tpu.dot_dimension_numbers<[1], [0], [0], [1], [0, 0, 1, 1], [], []>} : vector<8x128xf32>, vector<128x128xf32>, vector<8x128xf32> -> vector<8x128xf32>
    %c0_3 = arith.constant 0 : index
    %c0_4 = arith.constant 0 : index
    %3 = vector.load %arg3[%c0_3, %c0_4] : memref<1x128xf32, #tpu.memory_space<vmem>>, vector<1x128xf32>
    %4 = vector.broadcast %3 : vector<1x128xf32> to vector<8x128xf32>
    %5 = arith.addf %2, %4 : vector<8x128xf32>
    %cst_5 = arith.constant 5.000000e-01 : f32
    %6 = vector.broadcast %cst_5 : f32 to vector<8x128xf32>
    %7 = arith.mulf %6, %5 : vector<8x128xf32>
    %8 = math.tanh %7 : vector<8x128xf32>
    %cst_6 = arith.constant 5.000000e-01 : f32
    %9 = vector.broadcast %cst_6 : f32 to vector<8x128xf32>
    %10 = arith.mulf %9, %8 : vector<8x128xf32>
    %cst_7 = arith.constant 5.000000e-01 : f32
    %11 = vector.broadcast %cst_7 : f32 to vector<8x128xf32>
    %12 = arith.addf %10, %11 : vector<8x128xf32>
    %c0_8 = arith.constant 0 : index
    %c0_9 = arith.constant 0 : index
    %13 = vector.load %arg4[%c0_8, %c0_9] : memref<8x128xf32, #tpu.memory_space<vmem>>, vector<8x128xf32>
    tpu.vector_store %arg4[%c0_8, %c0_9], %12 {strides = array<i32>} : memref<8x128xf32, #tpu.memory_space<vmem>>, vector<8x128xf32>,
    return
  }
  func.func @transform_0(%arg0: i32) -> (i32, i32) {
    %c0_i32 = arith.constant 0 : i32
    %c0_i32_0 = arith.constant 0 : i32
    return %arg0, %c0_i32 : i32, i32
  }
  func.func @transform_1(%arg0: i32) -> (i32, i32) {
    %c0_i32 = arith.constant 0 : i32
    %c0_i32_0 = arith.constant 0 : i32
    %c0_i32_1 = arith.constant 0 : i32
    return %c0_i32, %c0_i32_0 : i32, i32
  }
  func.func @transform_2(%arg0: i32) -> (i32, i32) {
    %c0_i32 = arith.constant 0 : i32
    %c0_i32_0 = arith.constant 0 : i32
    %c0_i32_1 = arith.constant 0 : i32
    return %c0_i32, %c0_i32_0 : i32, i32
  }
  func.func @transform_3(%arg0: i32) -> (i32, i32) {
    %c0_i32 = arith.constant 0 : i32
    %c0_i32_0 = arith.constant 0 : i32
    return %arg0, %c0_i32 : i32, i32
  }
}

</mosaic_0001>

<bundles_post_ra>
// kernel: tpu_custom_call.1
= control target key start
LH: loop header
LB: loop body
LE: loop exit
PB: predicated region body
PF: predicated region fallthrough
CT: control target
= control target key end

     0   :  { %8 = vsyncpa [#allocation3], 0  ;;  %s323_s0 = inlined_call_operand.hbm [shape: f32[8,128], index: 0, kind: input, shape index: {}]   ;;  %s324_s1 = inlined_call_operand.hbm [shape: f32[128,128], index: 1, kind: input, shape index: {}]   ;;  %s325_s2 = inlined_call_operand.vmem [shape: f32[1,128], index: 2, kind: input, shape index: {}]   ;;  %s326_s3 = inlined_call_operand.hbm [shape: f32[8,128], index: 3, kind: output, shape index: {}]  }
   0x1   :  { %9 = vsyncpa [#allocation6], 0 }
   0x2   :  { %10 = vsyncpa [#allocation4], 0  ;;  %s284_s12 = smov [#allocation2]   ;;  %s285_s14 = smov [#allocation5]  }
   0x3   :  { %s17_s13 = sshll.u32 %s284_s12, 4  ;;  %s26_s15 = sshll.u32 %s285_s14, 4  ;;  %s18_s13 = int_to_ptr.vmem [resolvable:$true] %s17_s13  ;;  %s27_s15 = int_to_ptr.vmem [resolvable:$true] %s26_s15 }
   0x4   :  { %s226_s16 = scalar_lea.vmem %s18_s13, 128  ;;  %p231_p1 = scmp.lt.s32.totalorder %s18_s13, %s18_s13 }
   0x5   :  { %p227_p0 = scmp.ne.s32.totalorder %s18_s13, %s226_s16  ;;  %p232_p2 = scmp.lt.s32.totalorder %s226_s16, %s226_s16 }
   0x7   :  { %p233_p3 = por %p232_p2, %p231_p1 }
   0x9   :  { %p234_p4 = pnand %p233_p3, %p227_p0 }
   0xb   :  { %237 = shalt.err (!%p234_p4)
}
   0xc   :  { %20 = dma.hbm_to_vmem [thread:$0]  %s323_s0, 128, %s18_s13, [#allocation3]  }
   0xd   :  { %s246_s19 = scalar_lea.vmem %s27_s15, 2048  ;;  %p251_p6 = scmp.lt.s32.totalorder %s27_s15, %s27_s15 }
   0xe   :  { %p247_p5 = scmp.ne.s32.totalorder %s27_s15, %s246_s19  ;;  %p252_p7 = scmp.lt.s32.totalorder %s246_s19, %s246_s19 }
  0x10   :  { %p253_p8 = por %p252_p7, %p251_p6 }
  0x12   :  { %p254_p9 = pnand %p253_p8, %p247_p5 }
  0x14   :  { %257 = shalt.err (!%p254_p9)
}
  0x15   :  { %s286_s20 = smov 128   ;;  %s287_s21 = smov 8  }
  0x16   :  { %32 = dma.hbm_to_vmem [thread:$0]  %s324_s1, 2048, %s27_s15, [#allocation6], %s286_s20, %s286_s20, %s287_s21  }
  0x17   :  { %278 = dma.done.wait [#allocation3], 128  }
  0x18   :  { %279 = vsyncadd [#allocation3], 4294967168 }
  0x19   :  { %280 = dma.done.wait [#allocation6], 2048  }
  0x1a   :  { %281 = vsyncadd [#allocation6], 4294965248  ;;  %v288_v0 = vmov 0.0   ;;  %vm289_vm0 = vmmov 0   ;;  %v57_v1 = vld [vmem:[#allocation5 + $0x78] sm:$0xff]  ;;  %v56_v2 = vld [vmem:[#allocation5 + $0x70] sm:$0xff] }
  0x1b   :  { %174 = vmatprep.subr.mxu0 %v288_v0  ;;  %206 = vmatprep.mubr.msk.f32.mxu0 %vm289_vm0, %v288_v0  ;;  %v55_v3 = vld [vmem:[#allocation5 + $0x68] sm:$0xff]  ;;  %v54_v4 = vld [vmem:[#allocation5 + $0x60] sm:$0xff]  ;;  %v53_v5 = vld [vmem:[#allocation5 + $0x58] sm:$0xff]  ;;  %s290_s24 = smov [#allocation7]  }
  0x1c   :  { %175 = vmatpush3.msra.mxu0 %v57_v1  ;;  %v52_v6 = vld [vmem:[#allocation5 + $0x50] sm:$0xff]  ;;  %v51_v7 = vld [vmem:[#allocation5 + $0x48] sm:$0xff]  ;;  %v50_v8 = vld [vmem:[#allocation5 + $0x40] sm:$0xff]  ;;  %s146_s25 = sshll.u32 %s290_s24, 4  ;;  %s147_s25 = int_to_ptr.vmem [resolvable:$true] %s146_s25 }
  0x1d   :  { %176 = vmatprep.subr.mxu0 %v288_v0  ;;  %v49_v9 = vld [vmem:[#allocation5 + $0x38] sm:$0xff]  ;;  %v48_v10 = vld [vmem:[#allocation5 + $0x30] sm:$0xff]  ;;  %v47_v11 = vld [vmem:[#allocation5 + $0x28] sm:$0xff]  ;;  %s258_s26 = scalar_lea.vmem %s147_s25, 128  ;;  %p263_p11 = scmp.lt.s32.totalorder %s147_s25, %s147_s25 }
  0x1e   :  { %177 = vmatpush3.msra.mxu0 %v56_v2  ;;  %v46_v12 = vld [vmem:[#allocation5 + $0x20] sm:$0xff]  ;;  %v45_v13 = vld [vmem:[#allocation5 + $0x18] sm:$0xff]  ;;  %v44_v14 = vld [vmem:[#allocation5 + $0x10] sm:$0xff]  ;;  %p259_p10 = scmp.ne.s32.totalorder %s147_s25, %s258_s26  ;;  %p264_p12 = scmp.lt.s32.totalorder %s258_s26, %s258_s26 }
  0x1f   :  { %178 = vmatprep.subr.mxu0 %v288_v0  ;;  %v43_v15 = vld [vmem:[#allocation5 + $0x8] sm:$0xff]  ;;  %v42_v16 = vld [vmem:[#allocation5] sm:$0xff]  ;;  %v41_v17 = vld [vmem:[#allocation2] sm:$0xff] }
  0x20   :  { %179 = vmatpush3.msra.mxu0 %v55_v3  ;;  %v156_v18 = vld [vmem:[%s325_s2] ss:$0 sm:$0xff]  ;;  %p265_p13 = por %p264_p12, %p263_p11 }
  0x21   :  { %180 = vmatprep.subr.mxu0 %v288_v0 }
  0x22   :  { %181 = vmatpush3.msra.mxu0 %v54_v4  ;;  %p266_p0 = pnand %p265_p13, %p259_p10 }
  0x23   :  { %182 = vmatprep.subr.mxu0 %v288_v0 }
  0x24   :  { %183 = vmatpush3.msra.mxu0 %v53_v5 }
  0x25   :  { %184 = vmatprep.subr.mxu0 %v288_v0 }
  0x26   :  { %185 = vmatpush3.msra.mxu0 %v52_v6 }
  0x27   :  { %186 = vmatprep.subr.mxu0 %v288_v0 }
  0x28   :  { %187 = vmatpush3.msra.mxu0 %v51_v7 }
  0x29   :  { %188 = vmatprep.subr.mxu0 %v288_v0 }
  0x2a   :  { %189 = vmatpush3.msra.mxu0 %v50_v8 }
  0x2b   :  { %190 = vmatprep.subr.mxu0 %v288_v0 }
  0x2c   :  { %191 = vmatpush3.msra.mxu0 %v49_v9 }
  0x2d   :  { %192 = vmatprep.subr.mxu0 %v288_v0 }
  0x2e   :  { %193 = vmatpush3.msra.mxu0 %v48_v10 }
  0x2f   :  { %194 = vmatprep.subr.mxu0 %v288_v0 }
  0x30   :  { %195 = vmatpush3.msra.mxu0 %v47_v11 }
  0x31   :  { %196 = vmatprep.subr.mxu0 %v288_v0 }
  0x32   :  { %197 = vmatpush3.msra.mxu0 %v46_v12 }
  0x33   :  { %198 = vmatprep.subr.mxu0 %v288_v0 }
  0x34   :  { %199 = vmatpush3.msra.mxu0 %v45_v13 }
  0x35   :  { %200 = vmatprep.subr.mxu0 %v288_v0 }
  0x36   :  { %201 = vmatpush3.msra.mxu0 %v44_v14 }
  0x37   :  { %202 = vmatprep.subr.mxu0 %v288_v0 }
  0x38   :  { %203 = vmatpush3.msra.mxu0 %v43_v15 }
  0x39   :  { %204 = vmatprep.subr.mxu0 %v288_v0 }
  0x3a   :  { %205 = vmatpush3.msra.mxu0 %v42_v16 }
  0x3b   :  { %207 = vmatmul.mubr.f32.vlgmr.msra.gmra.mxu0 %v41_v17 }
  0xfb   :  { %v131_v19 = vpop.f32.mrf.mxu0 }
  0xfc   :  { %v132_v20 = vadd.f32 %v156_v18, %v131_v19 }
  0xfd   :  { %v208_v21 = vpop.f32.mrf.mxu0 }
  0xfe   :  { %v135_v22 = vmul.f32 0.5, %v132_v20 }
 0x100   :  { %216 = vtanh.f32 %v135_v22 }
 0x10d   :  { %v217_v23 = vpop.eup %216 }
 0x10e   :  { %v137_v24 = vmul.f32 0.5, %v217_v23 }
 0x110   :  { %v138_v25 = vadd.f32 0.5, %v137_v24 }
 0x112   :  { %139 = vst [vmem:[#allocation7] sm:$0xff] %v138_v25 }
 0x113   :  { %269 = shalt.err (!%p266_p0)
}
 0x114   :  { %149 = dma.vmem_to_hbm [thread:$0]  %s147_s25, 128, %s326_s3, [#allocation4]  }
 0x115   :  { %282 = dma.done.wait [#allocation4], 128  }
 0x116   :  { %283 = vsyncadd [#allocation4], 4294967168 }
 0x117   :  { %153 = vsyncpa [#allocation3], 1 }
 0x118   :  { %154 = vsyncpa [#allocation6], 1 }
 0x119   :  { %155 = vsyncpa [#allocation4], 1 }

</bundles_post_ra>
